<compile_context>
chip_gen: v7x
topology: tpu7x:2x2x1
jax: 0.10.0
libtpu: 0.0.40
codegen_flags: <defaults>
</compile_context>

<pallas_src>
from functools import partial

import numpy as np
import jax
import jax.numpy as jnp
from jax.experimental import pallas as pl
from jax.experimental.pallas import tpu as pltpu

RADIUS = 5
REG_TH = 10.0
_PAD_PRE = -1e4          # sigmoid(_PAD_PRE) == 0 exactly in f32 -> d == 0 in padding


def _hough_split_loss_kernel(xs_ref, ys_ref, sc_ref, pre_ref, gt_ref,
                             out_ref, w_ref, *, num_lanes, bt, a_log, r_log,
                             radius, unroll):
    # xs_ref / ys_ref : SMEM (B_pad*L,) int32   window centers (x on Angle axis,
    #                                           y on Rho axis, as in the reference)
    # sc_ref          : SMEM (B_pad*L,) float32 combined scale (0.0 == skipped lane)
    # pre_ref/gt_ref  : VMEM (Bt, A_pad, R_pad) hough blocks in compute dtype
    # out_ref         : VMEM (1, 1, 128)        lane 0 = window-loss partial,
    #                                           lane 1 = sum|sigmoid(pre) - gt|
    # w_ref           : VMEM (A_pad, R_pad) f32 rectangle-weight scratch
    step = pl.program_id(0)
    a_pad = pre_ref.shape[1]
    r_pad = pre_ref.shape[2]

    rows = jax.lax.broadcasted_iota(jnp.int32, (a_pad, 1), 0)   # Angle axis
    cols = jax.lax.broadcasted_iota(jnp.int32, (1, r_pad), 1)   # Rho axis

    def body(b, carry):
        ws, ds = carry
        # Cast in-kernel: wrapper ships bf16, halving HBM traffic.
        p = jax.nn.sigmoid(pre_ref[b].astype(jnp.float32))      # (A_pad, R_pad)
        g = gt_ref[b].astype(jnp.float32)
        d = jnp.abs(p - g)

        w_ref[...] = jnp.zeros_like(w_ref)
        base = (step * bt + b) * num_lanes
        for j in range(num_lanes):                               # static -> unrolled
            s = sc_ref[base + j]

            @pl.when(s != 0.0)                                   # skip padded lanes
            def _():
                x = xs_ref[base + j]
                y = ys_ref[base + j]
                # Reproduces the reference exactly: the Rho bound gates the
                # Angle slice and vice versa (deliberate x/y swap upstream).
                # Logical a_log/r_log are used, not the padded extents.
                left = jnp.minimum(x, radius)
                right = jnp.minimum(r_log - x, radius + 1)
                top = jnp.minimum(y, radius)
                bottom = jnp.minimum(a_log - y, radius + 1)
                row_m = jnp.logical_and(rows >= x - left, rows < x + right)  # (A,1)
                col_m = jnp.logical_and(cols >= y - top, cols < y + bottom)  # (1,R)
                w_ref[...] += (s * row_m.astype(jnp.float32)) * col_m.astype(jnp.float32)

        ws = ws + jnp.sum(d * w_ref[...])     # single reduction covering all lanes
        ds = ds + jnp.sum(d)                  # partial for fallback F.l1_loss(mean)
        return ws, ds

    ws, ds = jax.lax.fori_loop(0, bt, body,
                               (jnp.float32(0.0), jnp.float32(0.0)),
                               unroll=unroll)

    lane = jax.lax.broadcasted_iota(jnp.int32, (1, 1, 128), 2)
    out_ref[...] = jnp.where(lane == 0, ws,
                             jnp.where(lane == 1, ds, jnp.float32(0.0)))


def _round_up(v, m):
    return (v + m - 1) // m * m


def hough_split_loss(pre_hough, gt_hough, pre_points, gt_points,
                     radius=RADIUS, reg_th=REG_TH,
                     compute_dtype=jnp.bfloat16,
                     vmem_budget_bytes=20 * 1024 * 1024):
    """pre_points: already sorted + padded (B, L, 2); gt_points (B, L, 2)."""
    B, C, A, R = pre_hough.shape
    L = gt_points.shape[1]
    # Window loss only ever reads channel 0 (as in the reference); the
    # fallback-mean branch below also assumes one channel.
    assert C == 1, "HoughSplitLoss kernel assumes a single hough channel"
    # TODO(synk): extend the fallback F.l1_loss(mean) branch to C > 1 if needed.

    compute_dtype = jnp.dtype(compute_dtype)
    itemsize = compute_dtype.itemsize
    sublane = 8 * (4 // itemsize)             # 8 rows/vreg for f32, 16 for bf16
    a_pad = _round_up(A, sublane)
    r_pad = _round_up(R, 128)                 # lane-dense last dim

    # --- per-(batch, lane) scalar tables -------------------------------------
    pre_pts = jnp.asarray(pre_points)
    gt_pts = jnp.asarray(gt_points)
    pre_invalid = pre_pts[..., 0] < 0
    gt_invalid = gt_pts[..., 0] < 0
    both_invalid = jnp.logical_and(pre_invalid, gt_invalid)
    # point = pre if gt invalid else gt; int() truncation as in the reference.
    x = jnp.where(gt_invalid, pre_pts[..., 0], gt_pts[..., 0]).astype(jnp.int32)
    y = jnp.where(gt_invalid, pre_pts[..., 1], gt_pts[..., 1]).astype(jnp.int32)
    mult = jnp.where(jnp.logical_or(pre_invalid, gt_invalid), reg_th, 1.0)
    scale = jnp.where(both_invalid, 0.0, mult) / float(radius * radius)

    # --- batching: Bt batches per grid step (amortize ~0.35us/step overhead) --
    # 2 inputs x 2 pipeline buffers x (Bt, a_pad, r_pad) must fit the budget,
    # and we keep >= 2 grid steps so v7x can split the batch axis over 2 TCs.
    per_batch = 2 * 2 * a_pad * r_pad * itemsize
    bt_cap = max(1, vmem_budget_bytes // per_batch)
    bt = int(min(bt_cap, max(1, B // 2))) if B >= 2 else 1
    steps = -(-B // bt)
    b_pad = steps * bt

    pre2 = pre_hough.reshape(B, A, R).astype(jnp.float32)
    gt2 = gt_hough.reshape(B, A, R).astype(jnp.float32)
    pre2 = jnp.pad(pre2, ((0, b_pad - B), (0, a_pad - A), (0, r_pad - R)),
                   constant_values=_PAD_PRE)          # sigmoid(pad) == 0 exactly
    gt2 = jnp.pad(gt2, ((0, b_pad - B), (0, a_pad - A), (0, r_pad - R)),
                  constant_values=0.0)                # -> d == 0 in the padding
    # In production the maps would already arrive in bf16; here we cast at the
    # boundary so the kernel's HBM reads are halved.
    pre2 = pre2.astype(compute_dtype)
    gt2 = gt2.astype(compute_dtype)

    # Flat 1-D SMEM tables (no (8,128)-style SMEM padding blow-up); padded
    # batches get scale == 0 so the kernel skips them.
    xs = jnp.pad(x.reshape(-1), (0, (b_pad - B) * L)).astype(jnp.int32)
    ys = jnp.pad(y.reshape(-1), (0, (b_pad - B) * L)).astype(jnp.int32)
    scales = jnp.pad(scale.reshape(-1), (0, (b_pad - B) * L)).astype(jnp.float32)

    kernel = partial(_hough_split_loss_kernel, num_lanes=L, bt=bt,
                     a_log=A, r_log=R, radius=int(radius),
                     unroll=bool(bt <= 8))

    out = pl.pallas_call(
        kernel,
        grid=(steps,),
        in_specs=[
            pl.BlockSpec(memory_space=pltpu.MemorySpace.SMEM),
            pl.BlockSpec(memory_space=pltpu.MemorySpace.SMEM),
            pl.BlockSpec(memory_space=pltpu.MemorySpace.SMEM),
            pl.BlockSpec((bt, a_pad, r_pad), lambda s: (s, 0, 0)),
            pl.BlockSpec((bt, a_pad, r_pad), lambda s: (s, 0, 0)),
        ],
        out_specs=pl.BlockSpec((1, 1, 128), lambda s: (s, 0, 0)),
        out_shape=jax.ShapeDtypeStruct((steps, 1, 128), jnp.float32),
        scratch_shapes=[pltpu.VMEM((a_pad, r_pad), jnp.float32)],
        compiler_params=pltpu.CompilerParams(
            dimension_semantics=("parallel",),        # independent batch steps
            vmem_limit_bytes=32 * 1024 * 1024),       # v5e scoped default is 16 MiB
    )(xs, ys, scales, pre2, gt2)

    wsum = jnp.sum(out[:, 0, 0])
    dsum = jnp.sum(out[:, 0, 1])
    mean_l1 = dsum / (B * C * A * R)                  # fallback F.l1_loss(mean), C == 1
    return jnp.where(wsum == 0.0, mean_l1, wsum / B)


def prepare_pre_points(in_pre_points, max_num_lanes):
    # mirrors the torch.no_grad() block: sort by x*1e4 + y, pad with [-1,-1]
    pts = [sorted(p, key=lambda q: q[0] * 10000.0 + q[1]) for p in in_pre_points]
    pts = [p + [[-1.0, -1.0]] * (max_num_lanes - len(p)) if len(p) < max_num_lanes else p
           for p in pts]
    return np.array(pts, dtype=np.float32)


def reference_loss(pre_hough, gt_hough, in_pre_points, gt_points,
                   radius=RADIUS, reg_th=REG_TH):
    """Pure numpy replica of the PyTorch forward (for self-check)."""
    pre = 1.0 / (1.0 + np.exp(-pre_hough.astype(np.float64)))
    gt = gt_hough.astype(np.float64)
    B, L = gt_points.shape[0], gt_points.shape[1]
    A, R = gt.shape[-2], gt.shape[-1]
    pre_points = prepare_pre_points(in_pre_points, L)
    loss = 0.0
    for i in range(B):
        for j in range(L):
            pp, gp = pre_points[i][j], gt_points[i][j]
            if pp[0] < 0 and gp[0] < 0:
                continue
            point = pp if gp[0] < 0 else gp
            x, y = int(point[0]), int(point[1])
            left, right = min(x, radius), min(R - x, radius + 1)
            top, bottom = min(y, radius), min(A - y, radius + 1)
            gm = gt[i, 0][x - left:x + right, y - top:y + bottom]
            pm = pre[i, 0][x - left:x + right, y - top:y + bottom]
            l = np.sum(np.abs(pm - gm))
            if pp[0] < 0 or gp[0] < 0:
                l = l * reg_th
            loss += l / (radius * radius)
    if loss == 0:
        return float(np.mean(np.abs(pre - gt)))
    return float(loss / B)


if __name__ == "__main__":
    key = jax.random.PRNGKey(0)
    B, C, Angle, Rho = 2, 1, 32, 64
    max_num_lanes = 4

    k1, k2 = jax.random.split(key)
    pre_hough = jax.random.normal(k1, (B, C, Angle, Rho), dtype=jnp.float32)
    gt_hough = jax.random.uniform(k2, (B, C, Angle, Rho), dtype=jnp.float32)

    # deterministic point sets (variable-length predictions, -1-padded GT)
    in_pre_points = [
        [[11.0, 19.0], [2.0, 48.0], [25.0, 60.0]],
        [[5.0, 5.0]],
    ]
    gt_points_np = np.array([
        [[10.0, 20.0], [3.0, 50.0], [-1.0, -1.0], [-1.0, -1.0]],
        [[5.0, 6.0], [30.0, 10.0], [-1.0, -1.0], [-1.0, -1.0]],
    ], dtype=np.float32)

    # TODO(synk): the variable-length python-list sort/pad (torch.no_grad block)
    # stays as host glue — it has no array-kernel equivalent.
    pre_points_np = prepare_pre_points(in_pre_points, max_num_lanes)
    pre_pts = jnp.asarray(pre_points_np)
    gt_pts = jnp.asarray(gt_points_np)

    # --- f32 path: bit-faithful to the PyTorch forward -----------------------
    loss_f32 = hough_split_loss(pre_hough, gt_hough, pre_pts, gt_pts,
                                compute_dtype=jnp.float32)
    loss_f32 = jax.block_until_ready(loss_f32)
    ref_f32 = reference_loss(np.asarray(pre_hough), np.asarray(gt_hough),
                             in_pre_points, gt_points_np)
    assert np.allclose(float(loss_f32), ref_f32, rtol=1e-4, atol=1e-4), \
        (float(loss_f32), ref_f32)

    # --- bf16 path (default, half the HBM bytes): check against the reference
    # evaluated on the same bf16-quantized inputs ------------------------------
    loss_bf16 = hough_split_loss(pre_hough, gt_hough, pre_pts, gt_pts)
    loss_bf16 = jax.block_until_ready(loss_bf16)
    pre_q = np.asarray(pre_hough.astype(jnp.bfloat16).astype(jnp.float32))
    gt_q = np.asarray(gt_hough.astype(jnp.bfloat16).astype(jnp.float32))
    ref_bf16 = reference_loss(pre_q, gt_q, in_pre_points, gt_points_np)
    assert np.allclose(float(loss_bf16), ref_bf16, rtol=1e-3, atol=1e-3), \
        (float(loss_bf16), ref_bf16)

    print("KERNEL_OK")
</pallas_src>

<mosaic_0001>
module attributes {stable_mosaic.version = 11 : i64} {
  func.func @_hough_split_loss_kernel(%arg0: i32, %arg1: memref<8xi32, #tpu.memory_space<smem>>, %arg2: memref<8xi32, #tpu.memory_space<smem>>, %arg3: memref<8xf32, #tpu.memory_space<smem>>, %arg4: memref<1x32x128xf32, #tpu.memory_space<vmem>>, %arg5: memref<1x32x128xf32, #tpu.memory_space<vmem>>, %arg6: memref<1x1x128xf32, #tpu.memory_space<vmem>>, %arg7: memref<32x128xf32, #tpu.memory_space<vmem>>) attributes {dimension_semantics = [#tpu.dimension_semantics<parallel>], iteration_bounds = array<i64: 2>, scalar_prefetch = 0 : i64, scratch_operands = 1 : i64, tpu.core_type = #tpu.core_type<tc>, window_params = [{transform_indices = @transform_0, window_bounds = array<i64: 8>}, {transform_indices = @transform_1, window_bounds = array<i64: 8>}, {transform_indices = @transform_2, window_bounds = array<i64: 8>}, {transform_indices = @transform_3, window_bounds = array<i64: 1, 32, 128>}, {transform_indices = @transform_4, window_bounds = array<i64: 1, 32, 128>}, {transform_indices = @transform_5, window_bounds = array<i64: 1, 1, 128>}]} {
    %0 = tpu.iota {dimensions = array<i32: 0>} : vector<32x1xi32>
    %1 = tpu.iota {dimensions = array<i32: 1>} : vector<1x128xi32>
    %cst = arith.constant 0.000000e+00 : f32
    %cst_0 = arith.constant 0.000000e+00 : f32
    %c0_i32 = arith.constant 0 : i32
    %2 = arith.index_cast %c0_i32 : i32 to index
    %c0 = arith.constant 0 : index
    %c0_1 = arith.constant 0 : index
    %3 = vector.load %arg4[%2, %c0, %c0_1] : memref<1x32x128xf32, #tpu.memory_space<vmem>>, vector<1x32x128xf32>
    %4 = vector.shape_cast %3 : vector<1x32x128xf32> to vector<32x128xf32>
    %5 = arith.negf %4 : vector<32x128xf32>
    %6 = math.exp %5 : vector<32x128xf32>
    %cst_2 = arith.constant 1.000000e+00 : f32
    %7 = vector.broadcast %cst_2 : f32 to vector<32x128xf32>
    %8 = arith.addf %7, %6 : vector<32x128xf32>
    %9 = arith.divf %7, %8 : vector<32x128xf32>
    %10 = arith.index_cast %c0_i32 : i32 to index
    %c0_3 = arith.constant 0 : index
    %c0_4 = arith.constant 0 : index
    %11 = vector.load %arg5[%10, %c0_3, %c0_4] : memref<1x32x128xf32, #tpu.memory_space<vmem>>, vector<1x32x128xf32>
    %12 = vector.shape_cast %11 : vector<1x32x128xf32> to vector<32x128xf32>
    %13 = arith.subf %9, %12 : vector<32x128xf32>
    %14 = math.absf %13 : vector<32x128xf32>
    %cst_5 = arith.constant 0.000000e+00 : f32
    %15 = vector.broadcast %cst_5 : f32 to vector<32x128xf32>
    %c0_6 = arith.constant 0 : index
    %c0_7 = arith.constant 0 : index
    %16 = vector.load %arg7[%c0_6, %c0_7] : memref<32x128xf32, #tpu.memory_space<vmem>>, vector<32x128xf32>
    tpu.vector_store %arg7[%c0_6, %c0_7], %15 {strides = array<i32>} : memref<32x128xf32, #tpu.memory_space<vmem>>, vector<32x128xf32>,
    %c1_i32 = arith.constant 1 : i32
    %17 = arith.muli %arg0, %c1_i32 : i32
    %18 = arith.addi %17, %c0_i32 : i32
    %c4_i32 = arith.constant 4 : i32
    %19 = arith.muli %18, %c4_i32 : i32
    %c0_i32_8 = arith.constant 0 : i32
    %20 = arith.addi %19, %c0_i32_8 : i32
    %21 = arith.index_cast %20 : i32 to index
    %22 = memref.load %arg3[%21] : memref<8xf32, #tpu.memory_space<smem>>
    %cst_9 = arith.constant 0.000000e+00 : f32
    %23 = arith.cmpf one, %22, %cst_9 : f32
    %24 = arith.extui %23 : i1 to i32
    %c0_i32_10 = arith.constant 0 : i32
    %25 = arith.cmpi ne, %24, %c0_i32_10 : i32
    scf.if %25 {
      %c0_i32_29 = arith.constant 0 : i32
      %67 = arith.addi %19, %c0_i32_29 : i32
      %68 = arith.index_cast %67 : i32 to index
      %69 = memref.load %arg1[%68] : memref<8xi32, #tpu.memory_space<smem>>
      %c0_i32_30 = arith.constant 0 : i32
      %70 = arith.addi %19, %c0_i32_30 : i32
      %71 = arith.index_cast %70 : i32 to index
      %72 = memref.load %arg2[%71] : memref<8xi32, #tpu.memory_space<smem>>
      %c5_i32 = arith.constant 5 : i32
      %73 = arith.minsi %69, %c5_i32 : i32
      %c64_i32 = arith.constant 64 : i32
      %74 = arith.subi %c64_i32, %69 : i32
      %c6_i32 = arith.constant 6 : i32
      %75 = arith.minsi %74, %c6_i32 : i32
      %c5_i32_31 = arith.constant 5 : i32
      %76 = arith.minsi %72, %c5_i32_31 : i32
      %c32_i32 = arith.constant 32 : i32
      %77 = arith.subi %c32_i32, %72 : i32
      %c6_i32_32 = arith.constant 6 : i32
      %78 = arith.minsi %77, %c6_i32_32 : i32
      %79 = arith.subi %69, %73 : i32
      %80 = vector.broadcast %79 : i32 to vector<32x1xi32>
      %81 = arith.cmpi sge, %0, %80 : vector<32x1xi32>
      %82 = arith.addi %69, %75 : i32
      %83 = vector.broadcast %82 : i32 to vector<32x1xi32>
      %84 = arith.cmpi slt, %0, %83 : vector<32x1xi32>
      %85 = arith.andi %81, %84 : vector<32x1xi1>
      %86 = arith.subi %72, %76 : i32
      %87 = vector.broadcast %86 : i32 to vector<1x128xi32>
      %88 = arith.cmpi sge, %1, %87 : vector<1x128xi32>
      %89 = arith.addi %72, %78 : i32
      %90 = vector.broadcast %89 : i32 to vector<1x128xi32>
      %91 = arith.cmpi slt, %1, %90 : vector<1x128xi32>
      %92 = arith.andi %88, %91 : vector<1x128xi1>
      %c0_33 = arith.constant 0 : index
      %c0_34 = arith.constant 0 : index
      %93 = vector.load %arg7[%c0_33, %c0_34] : memref<32x128xf32, #tpu.memory_space<vmem>>, vector<32x128xf32>
      %94 = arith.extui %85 : vector<32x1xi1> to vector<32x1xi32>
      %95 = arith.sitofp %94 : vector<32x1xi32> to vector<32x1xf32>
      %96 = vector.broadcast %22 : f32 to vector<32x1xf32>
      %97 = arith.mulf %96, %95 : vector<32x1xf32>
      %98 = arith.extui %92 : vector<1x128xi1> to vector<1x128xi32>
      %99 = arith.sitofp %98 : vector<1x128xi32> to vector<1x128xf32>
      %100 = vector.broadcast %97 : vector<32x1xf32> to vector<32x128xf32>
      %101 = vector.broadcast %99 : vector<1x128xf32> to vector<32x128xf32>
      %102 = arith.mulf %100, %101 : vector<32x128xf32>
      %103 = arith.addf %93, %102 : vector<32x128xf32>
      %c0_35 = arith.constant 0 : index
      %c0_36 = arith.constant 0 : index
      %104 = vector.load %arg7[%c0_35, %c0_36] : memref<32x128xf32, #tpu.memory_space<vmem>>, vector<32x128xf32>
      tpu.vector_store %arg7[%c0_35, %c0_36], %103 {strides = array<i32>} : memref<32x128xf32, #tpu.memory_space<vmem>>, vector<32x128xf32>,
    } else {
    }
    %c1_i32_11 = arith.constant 1 : i32
    %26 = arith.addi %19, %c1_i32_11 : i32
    %27 = arith.index_cast %26 : i32 to index
    %28 = memref.load %arg3[%27] : memref<8xf32, #tpu.memory_space<smem>>
    %cst_12 = arith.constant 0.000000e+00 : f32
    %29 = arith.cmpf one, %28, %cst_12 : f32
    %30 = arith.extui %29 : i1 to i32
    %c0_i32_13 = arith.constant 0 : i32
    %31 = arith.cmpi ne, %30, %c0_i32_13 : i32
    scf.if %31 {
      %c1_i32_29 = arith.constant 1 : i32
      %67 = arith.addi %19, %c1_i32_29 : i32
      %68 = arith.index_cast %67 : i32 to index
      %69 = memref.load %arg1[%68] : memref<8xi32, #tpu.memory_space<smem>>
      %c1_i32_30 = arith.constant 1 : i32
      %70 = arith.addi %19, %c1_i32_30 : i32
      %71 = arith.index_cast %70 : i32 to index
      %72 = memref.load %arg2[%71] : memref<8xi32, #tpu.memory_space<smem>>
      %c5_i32 = arith.constant 5 : i32
      %73 = arith.minsi %69, %c5_i32 : i32
      %c64_i32 = arith.constant 64 : i32
      %74 = arith.subi %c64_i32, %69 : i32
      %c6_i32 = arith.constant 6 : i32
      %75 = arith.minsi %74, %c6_i32 : i32
      %c5_i32_31 = arith.constant 5 : i32
      %76 = arith.minsi %72, %c5_i32_31 : i32
      %c32_i32 = arith.constant 32 : i32
      %77 = arith.subi %c32_i32, %72 : i32
      %c6_i32_32 = arith.constant 6 : i32
      %78 = arith.minsi %77, %c6_i32_32 : i32
      %79 = arith.subi %69, %73 : i32
      %80 = vector.broadcast %79 : i32 to vector<32x1xi32>
      %81 = arith.cmpi sge, %0, %80 : vector<32x1xi32>
      %82 = arith.addi %69, %75 : i32
      %83 = vector.broadcast %82 : i32 to vector<32x1xi32>
      %84 = arith.cmpi slt, %0, %83 : vector<32x1xi32>
      %85 = arith.andi %81, %84 : vector<32x1xi1>
      %86 = arith.subi %72, %76 : i32
      %87 = vector.broadcast %86 : i32 to vector<1x128xi32>
      %88 = arith.cmpi sge, %1, %87 : vector<1x128xi32>
      %89 = arith.addi %72, %78 : i32
      %90 = vector.broadcast %89 : i32 to vector<1x128xi32>
      %91 = arith.cmpi slt, %1, %90 : vector<1x128xi32>
      %92 = arith.andi %88, %91 : vector<1x128xi1>
      %c0_33 = arith.constant 0 : index
      %c0_34 = arith.constant 0 : index
      %93 = vector.load %arg7[%c0_33, %c0_34] : memref<32x128xf32, #tpu.memory_space<vmem>>, vector<32x128xf32>
      %94 = arith.extui %85 : vector<32x1xi1> to vector<32x1xi32>
      %95 = arith.sitofp %94 : vector<32x1xi32> to vector<32x1xf32>
      %96 = vector.broadcast %28 : f32 to vector<32x1xf32>
      %97 = arith.mulf %96, %95 : vector<32x1xf32>
      %98 = arith.extui %92 : vector<1x128xi1> to vector<1x128xi32>
      %99 = arith.sitofp %98 : vector<1x128xi32> to vector<1x128xf32>
      %100 = vector.broadcast %97 : vector<32x1xf32> to vector<32x128xf32>
      %101 = vector.broadcast %99 : vector<1x128xf32> to vector<32x128xf32>
      %102 = arith.mulf %100, %101 : vector<32x128xf32>
      %103 = arith.addf %93, %102 : vector<32x128xf32>
      %c0_35 = arith.constant 0 : index
      %c0_36 = arith.constant 0 : index
      %104 = vector.load %arg7[%c0_35, %c0_36] : memref<32x128xf32, #tpu.memory_space<vmem>>, vector<32x128xf32>
      tpu.vector_store %arg7[%c0_35, %c0_36], %103 {strides = array<i32>} : memref<32x128xf32, #tpu.memory_space<vmem>>, vector<32x128xf32>,
    } else {
    }
    %c2_i32 = arith.constant 2 : i32
    %32 = arith.addi %19, %c2_i32 : i32
    %33 = arith.index_cast %32 : i32 to index
    %34 = memref.load %arg3[%33] : memref<8xf32, #tpu.memory_space<smem>>
    %cst_14 = arith.constant 0.000000e+00 : f32
    %35 = arith.cmpf one, %34, %cst_14 : f32
    %36 = arith.extui %35 : i1 to i32
    %c0_i32_15 = arith.constant 0 : i32
    %37 = arith.cmpi ne, %36, %c0_i32_15 : i32
    scf.if %37 {
      %c2_i32_29 = arith.constant 2 : i32
      %67 = arith.addi %19, %c2_i32_29 : i32
      %68 = arith.index_cast %67 : i32 to index
      %69 = memref.load %arg1[%68] : memref<8xi32, #tpu.memory_space<smem>>
      %c2_i32_30 = arith.constant 2 : i32
      %70 = arith.addi %19, %c2_i32_30 : i32
      %71 = arith.index_cast %70 : i32 to index
      %72 = memref.load %arg2[%71] : memref<8xi32, #tpu.memory_space<smem>>
      %c5_i32 = arith.constant 5 : i32
      %73 = arith.minsi %69, %c5_i32 : i32
      %c64_i32 = arith.constant 64 : i32
      %74 = arith.subi %c64_i32, %69 : i32
      %c6_i32 = arith.constant 6 : i32
      %75 = arith.minsi %74, %c6_i32 : i32
      %c5_i32_31 = arith.constant 5 : i32
      %76 = arith.minsi %72, %c5_i32_31 : i32
      %c32_i32 = arith.constant 32 : i32
      %77 = arith.subi %c32_i32, %72 : i32
      %c6_i32_32 = arith.constant 6 : i32
      %78 = arith.minsi %77, %c6_i32_32 : i32
      %79 = arith.subi %69, %73 : i32
      %80 = vector.broadcast %79 : i32 to vector<32x1xi32>
      %81 = arith.cmpi sge, %0, %80 : vector<32x1xi32>
      %82 = arith.addi %69, %75 : i32
      %83 = vector.broadcast %82 : i32 to vector<32x1xi32>
      %84 = arith.cmpi slt, %0, %83 : vector<32x1xi32>
      %85 = arith.andi %81, %84 : vector<32x1xi1>
      %86 = arith.subi %72, %76 : i32
      %87 = vector.broadcast %86 : i32 to vector<1x128xi32>
      %88 = arith.cmpi sge, %1, %87 : vector<1x128xi32>
      %89 = arith.addi %72, %78 : i32
      %90 = vector.broadcast %89 : i32 to vector<1x128xi32>
      %91 = arith.cmpi slt, %1, %90 : vector<1x128xi32>
      %92 = arith.andi %88, %91 : vector<1x128xi1>
      %c0_33 = arith.constant 0 : index
      %c0_34 = arith.constant 0 : index
      %93 = vector.load %arg7[%c0_33, %c0_34] : memref<32x128xf32, #tpu.memory_space<vmem>>, vector<32x128xf32>
      %94 = arith.extui %85 : vector<32x1xi1> to vector<32x1xi32>
      %95 = arith.sitofp %94 : vector<32x1xi32> to vector<32x1xf32>
      %96 = vector.broadcast %34 : f32 to vector<32x1xf32>
      %97 = arith.mulf %96, %95 : vector<32x1xf32>
      %98 = arith.extui %92 : vector<1x128xi1> to vector<1x128xi32>
      %99 = arith.sitofp %98 : vector<1x128xi32> to vector<1x128xf32>
      %100 = vector.broadcast %97 : vector<32x1xf32> to vector<32x128xf32>
      %101 = vector.broadcast %99 : vector<1x128xf32> to vector<32x128xf32>
      %102 = arith.mulf %100, %101 : vector<32x128xf32>
      %103 = arith.addf %93, %102 : vector<32x128xf32>
      %c0_35 = arith.constant 0 : index
      %c0_36 = arith.constant 0 : index
      %104 = vector.load %arg7[%c0_35, %c0_36] : memref<32x128xf32, #tpu.memory_space<vmem>>, vector<32x128xf32>
      tpu.vector_store %arg7[%c0_35, %c0_36], %103 {strides = array<i32>} : memref<32x128xf32, #tpu.memory_space<vmem>>, vector<32x128xf32>,
    } else {
    }
    %c3_i32 = arith.constant 3 : i32
    %38 = arith.addi %19, %c3_i32 : i32
    %39 = arith.index_cast %38 : i32 to index
    %40 = memref.load %arg3[%39] : memref<8xf32, #tpu.memory_space<smem>>
    %cst_16 = arith.constant 0.000000e+00 : f32
    %41 = arith.cmpf one, %40, %cst_16 : f32
    %42 = arith.extui %41 : i1 to i32
    %c0_i32_17 = arith.constant 0 : i32
    %43 = arith.cmpi ne, %42, %c0_i32_17 : i32
    scf.if %43 {
      %c3_i32_29 = arith.constant 3 : i32
      %67 = arith.addi %19, %c3_i32_29 : i32
      %68 = arith.index_cast %67 : i32 to index
      %69 = memref.load %arg1[%68] : memref<8xi32, #tpu.memory_space<smem>>
      %c3_i32_30 = arith.constant 3 : i32
      %70 = arith.addi %19, %c3_i32_30 : i32
      %71 = arith.index_cast %70 : i32 to index
      %72 = memref.load %arg2[%71] : memref<8xi32, #tpu.memory_space<smem>>
      %c5_i32 = arith.constant 5 : i32
      %73 = arith.minsi %69, %c5_i32 : i32
      %c64_i32 = arith.constant 64 : i32
      %74 = arith.subi %c64_i32, %69 : i32
      %c6_i32 = arith.constant 6 : i32
      %75 = arith.minsi %74, %c6_i32 : i32
      %c5_i32_31 = arith.constant 5 : i32
      %76 = arith.minsi %72, %c5_i32_31 : i32
      %c32_i32 = arith.constant 32 : i32
      %77 = arith.subi %c32_i32, %72 : i32
      %c6_i32_32 = arith.constant 6 : i32
      %78 = arith.minsi %77, %c6_i32_32 : i32
      %79 = arith.subi %69, %73 : i32
      %80 = vector.broadcast %79 : i32 to vector<32x1xi32>
      %81 = arith.cmpi sge, %0, %80 : vector<32x1xi32>
      %82 = arith.addi %69, %75 : i32
      %83 = vector.broadcast %82 : i32 to vector<32x1xi32>
      %84 = arith.cmpi slt, %0, %83 : vector<32x1xi32>
      %85 = arith.andi %81, %84 : vector<32x1xi1>
      %86 = arith.subi %72, %76 : i32
      %87 = vector.broadcast %86 : i32 to vector<1x128xi32>
      %88 = arith.cmpi sge, %1, %87 : vector<1x128xi32>
      %89 = arith.addi %72, %78 : i32
      %90 = vector.broadcast %89 : i32 to vector<1x128xi32>
      %91 = arith.cmpi slt, %1, %90 : vector<1x128xi32>
      %92 = arith.andi %88, %91 : vector<1x128xi1>
      %c0_33 = arith.constant 0 : index
      %c0_34 = arith.constant 0 : index
      %93 = vector.load %arg7[%c0_33, %c0_34] : memref<32x128xf32, #tpu.memory_space<vmem>>, vector<32x128xf32>
      %94 = arith.extui %85 : vector<32x1xi1> to vector<32x1xi32>
      %95 = arith.sitofp %94 : vector<32x1xi32> to vector<32x1xf32>
      %96 = vector.broadcast %40 : f32 to vector<32x1xf32>
      %97 = arith.mulf %96, %95 : vector<32x1xf32>
      %98 = arith.extui %92 : vector<1x128xi1> to vector<1x128xi32>
      %99 = arith.sitofp %98 : vector<1x128xi32> to vector<1x128xf32>
      %100 = vector.broadcast %97 : vector<32x1xf32> to vector<32x128xf32>
      %101 = vector.broadcast %99 : vector<1x128xf32> to vector<32x128xf32>
      %102 = arith.mulf %100, %101 : vector<32x128xf32>
      %103 = arith.addf %93, %102 : vector<32x128xf32>
      %c0_35 = arith.constant 0 : index
      %c0_36 = arith.constant 0 : index
      %104 = vector.load %arg7[%c0_35, %c0_36] : memref<32x128xf32, #tpu.memory_space<vmem>>, vector<32x128xf32>
      tpu.vector_store %arg7[%c0_35, %c0_36], %103 {strides = array<i32>} : memref<32x128xf32, #tpu.memory_space<vmem>>, vector<32x128xf32>,
    } else {
    }
    %c0_18 = arith.constant 0 : index
    %c0_19 = arith.constant 0 : index
    %44 = vector.load %arg7[%c0_18, %c0_19] : memref<32x128xf32, #tpu.memory_space<vmem>>, vector<32x128xf32>
    %45 = arith.mulf %14, %44 : vector<32x128xf32>
    %46 = vector.shape_cast %45 : vector<32x128xf32> to vector<1x32x128xf32>
    %cst_20 = arith.constant dense<0.000000e+00> : vector<1xf32>
    %47 = vector.multi_reduction <add>, %46, %cst_20 [1, 2] : vector<1x32x128xf32> to vector<1xf32>
    %48 = vector.shape_cast %47 : vector<1xf32> to vector<1x1x1xf32>
    %49 = vector.extract %48[0, 0, 0] : f32 from vector<1x1x1xf32>
    %50 = arith.addf %cst, %49 : f32
    %51 = vector.shape_cast %14 : vector<32x128xf32> to vector<1x32x128xf32>
    %cst_21 = arith.constant dense<0.000000e+00> : vector<1xf32>
    %52 = vector.multi_reduction <add>, %51, %cst_21 [1, 2] : vector<1x32x128xf32> to vector<1xf32>
    %53 = vector.shape_cast %52 : vector<1xf32> to vector<1x1x1xf32>
    %54 = vector.extract %53[0, 0, 0] : f32 from vector<1x1x1xf32>
    %55 = arith.addf %cst_0, %54 : f32
    %c1_i32_22 = arith.constant 1 : i32
    %56 = tpu.iota {dimensions = array<i32: 2>} : vector<1x1x128xi32>
    %c0_i32_23 = arith.constant 0 : i32
    %57 = vector.broadcast %c0_i32_23 : i32 to vector<1x1x128xi32>
    %58 = arith.cmpi eq, %56, %57 : vector<1x1x128xi32>
    %c1_i32_24 = arith.constant 1 : i32
    %59 = vector.broadcast %c1_i32_24 : i32 to vector<1x1x128xi32>
    %60 = arith.cmpi eq, %56, %59 : vector<1x1x128xi32>
    %cst_25 = arith.constant 0.000000e+00 : f32
    %61 = vector.broadcast %55 : f32 to vector<1x1x128xf32>
    %62 = vector.broadcast %cst_25 : f32 to vector<1x1x128xf32>
    %63 = arith.select %60, %61, %62 : vector<1x1x128xi1>, vector<1x1x128xf32>
    %64 = vector.broadcast %50 : f32 to vector<1x1x128xf32>
    %65 = arith.select %58, %64, %63 : vector<1x1x128xi1>, vector<1x1x128xf32>
    %c0_26 = arith.constant 0 : index
    %c0_27 = arith.constant 0 : index
    %c0_28 = arith.constant 0 : index
    %66 = vector.load %arg6[%c0_26, %c0_27, %c0_28] : memref<1x1x128xf32, #tpu.memory_space<vmem>>, vector<1x1x128xf32>
    tpu.vector_store %arg6[%c0_26, %c0_27, %c0_28], %65 {strides = array<i32>} : memref<1x1x128xf32, #tpu.memory_space<vmem>>, vector<1x1x128xf32>,
    return
  }
  func.func @transform_0(%arg0: i32) -> i32 {
    %c0_i32 = arith.constant 0 : i32
    %c0_i32_0 = arith.constant 0 : i32
    return %c0_i32 : i32
  }
  func.func @transform_1(%arg0: i32) -> i32 {
    %c0_i32 = arith.constant 0 : i32
    %c0_i32_0 = arith.constant 0 : i32
    return %c0_i32 : i32
  }
  func.func @transform_2(%arg0: i32) -> i32 {
    %c0_i32 = arith.constant 0 : i32
    %c0_i32_0 = arith.constant 0 : i32
    return %c0_i32 : i32
  }
  func.func @transform_3(%arg0: i32) -> (i32, i32, i32) {
    %c0_i32 = arith.constant 0 : i32
    %c0_i32_0 = arith.constant 0 : i32
    %c0_i32_1 = arith.constant 0 : i32
    return %arg0, %c0_i32, %c0_i32_0 : i32, i32, i32
  }
  func.func @transform_4(%arg0: i32) -> (i32, i32, i32) {
    %c0_i32 = arith.constant 0 : i32
    %c0_i32_0 = arith.constant 0 : i32
    %c0_i32_1 = arith.constant 0 : i32
    return %arg0, %c0_i32, %c0_i32_0 : i32, i32, i32
  }
  func.func @transform_5(%arg0: i32) -> (i32, i32, i32) {
    %c0_i32 = arith.constant 0 : i32
    %c0_i32_0 = arith.constant 0 : i32
    %c0_i32_1 = arith.constant 0 : i32
    return %arg0, %c0_i32, %c0_i32_0 : i32, i32, i32
  }
}

</mosaic_0001>

<bundles_post_ra>
// kernel: tpu_custom_call.1
= control target key start
LH: loop header
LB: loop body
LE: loop exit
PB: predicated region body
PF: predicated region fallthrough
CT: control target
= control target key end

     0   :  { %s1637_s0 = inlined_call_operand.hbm [shape: s32[8], index: 0, kind: input, shape index: {}]   ;;  %s1638_s1 = inlined_call_operand.vmem [shape: s32[8], index: 1, kind: input, shape index: {}]   ;;  %s1639_s2 = inlined_call_operand.vmem [shape: f32[8], index: 2, kind: input, shape index: {}]   ;;  %s1640_s3 = inlined_call_operand.hbm [shape: f32[2,32,128], index: 3, kind: input, shape index: {}]   ;;  %s1641_s4 = inlined_call_operand.hbm [shape: f32[2,32,128], index: 4, kind: input, shape index: {}]   ;;  %s1642_s5 = inlined_call_operand.hbm [shape: f32[2,1,128], index: 5, kind: output, shape index: {}]  }
   0x1   :  { %1646 = sst [smem:[#allocation21_spill]] %s1637_s0 }
   0x2   :  { %1647 = sst [smem:[#allocation22_spill]] %s1638_s1 }
   0x3   :  { %10 = vsyncpa [#allocation6], 0 }
   0x4   :  { %11 = vsyncpa [#allocation7], 0 }
   0x5   :  { %12 = vsyncpa [#allocation10], 0 }
   0x6   :  { %13 = vsyncpa [#allocation4], 0 }
   0x7   :  { %15 = vsyncpa [#allocation4 + $0x1], 0 }
   0x8   :  { %16 = vsyncpa [#allocation13], 0 }
   0x9   :  { %18 = vsyncpa [#allocation13 + $0x1], 0 }
   0xa   :  { %19 = vsyncpa [#allocation5], 0 }
   0xb   :  { %21 = vsyncpa [#allocation5 + $0x1], 0  ;;  %s1223_s18 = smov 0   ;;  %s1225_s19 = smov 0  }
   0xc   :  { %s1227_s20 = smov 0   ;;  %s1229_s21 = smov 0  }
   0xd LB: > { %s1244_s22 = sadd.s32 4294967295, %s1178_s21   ;;  %s836_s23 = sadd.s32 4294967294, %s1178_s21   ;;  %s1178_s21 = sphi %s1229_s21, %s1670_s21   ;;  %s1174_s20 = sphi %s1227_s20, %s1669_s20   ;;  %s1170_s19 = sphi %s1225_s19, %s1668_s19   ;;  %s1166_s18 = sphi %s1223_s18, %s1667_s18  }
   0xe   : > { %p110_p0 = scmp.ne.s32.totalorder %s1170_s19, %s1166_s18  ;;  %p1643_p1 = scmp.eq.s32.totalorder %s1244_s22, 0 }
   0xf   : > { %p166_p3 = scmp.eq.s32.totalorder %s836_s23, 1  ;;  %p837_p5 = scmp.ge.s32.totalorder %s1178_s21, 1 }
  0x10   : > { %p1253_p4 = por %p1643_p1, %p110_p0  ;;  %p173_p7 = scmp.lt.s32.totalorder %s1178_s21, 3 }
  0x11   : > { %p1258_p6 = por %p166_p3, %p110_p0  ;;  %s1651_s1 = sld [smem:[#allocation22_spill]] }
  0x12   : > { %s1648_s24 = scalar_select %p1253_p4, 1, 0 }
  0x13   : > { %s1649_s25 = scalar_select %p1258_p6, 1, 0 }
  0x14   : > { %p1263_p8 = pnand %p837_p5, %p173_p7  ;;  %s206_s7 = sshll.u32 %s1639_s2, 4  ;;  %s1282_s7 = int_to_ptr.vmem [resolvable:$true] %s206_s7 }
  0x15   : > { %s1285_s9 = sadd.s32 1, %s1178_s21   ;;  %s1653_s0 = sld [smem:[#allocation21_spill]] }
  0x16   : > { %p906_p10 = pneg %p1263_p8 }
  0x17   : > { %s195_s29 = sshll.u32 %s1651_s1, 4  ;;  %s196_s29 = int_to_ptr.vmem [resolvable:$true] %s195_s29 }
  0x18   : > { %p1278_p11 = pnand %p906_p10, %p1643_p1 }
  0x1a   : > { %p995_p13 = pneg %p1278_p11 }
  0x1b   : > { %s993_s12 = scalar_lea.hbm %s1653_s0, 16 }
  0x1c   : > { %p994_p12 = scmp.ne.s32.totalorder %s1653_s0, %s993_s12  ;;  %p1000_p5 = scmp.lt.u32.totalorder %s993_s12, %s1653_s0 }
  0x1e   : > { %p996_p0 = pnand %p995_p13, %p994_p12 }
  0x20   : > { %p997_p3 = pneg %p996_p0 }
  0x22   : > { %p1002_p7 = pnand %p1000_p5, %p997_p3 }
  0x24   : > { %1005 = shalt.err (!%p1002_p7)
}
  0x25   : > { %s1180_s17 = smov [#allocation3]   ;;  %s1006_s28 = scalar_lea.vmem %s196_s29, 16 }
  0x26   : > { %909 = dma.hbm_to_smem (!%p1278_p11), %s1653_s0, 16, %s1180_s17, [#allocation6]  }
  0x27   : > { %p1007_p10 = scmp.ne.s32.totalorder %s196_s29, %s1006_s28  ;;  %p1014_p9 = scmp.lt.s32.totalorder %s196_s29, %s196_s29 }
  0x28   : > { %p1015_p1 = scmp.lt.s32.totalorder %s1006_s28, %s1006_s28 }
  0x29   : > { %p1009_p12 = pnand %p1007_p10, %p995_p13 }
  0x2a   : > { %p1016_p2 = por %p1015_p1, %p1014_p9 }
  0x2b   : > { %p1010_p0 = pneg %p1009_p12 }
  0x2d   : > { %p1017_p6 = pnand %p1016_p2, %p1010_p0 }
  0x2f   : > { %1020 = shalt.err (!%p1017_p6)
}
  0x30   : > { %s1181_s30 = smov [#allocation8]   ;;  %s1021_s6 = scalar_lea.vmem %s1282_s7, 16 }
  0x31   : > { %912 = dma.vmem_to_smem (!%p1278_p11), %s196_s29, 16, %s1181_s30, [#allocation7]  }
  0x32   : > { %p1022_p3 = scmp.ne.s32.totalorder %s1282_s7, %s1021_s6  ;;  %p1029_p10 = scmp.lt.s32.totalorder %s1282_s7, %s1282_s7 }
  0x33   : > { %p1030_p12 = scmp.lt.s32.totalorder %s1021_s6, %s1021_s6 }
  0x34   : > { %p1024_p5 = pnand %p1022_p3, %p995_p13 }
  0x35   : > { %p1031_p1 = por %p1030_p12, %p1029_p10 }
  0x36   : > { %p1025_p7 = pneg %p1024_p5 }
  0x38   : > { %p1032_p2 = pnand %p1031_p1, %p1025_p7 }
  0x3a   : > { %1035 = shalt.err (!%p1032_p2)
}
  0x3b   : > { %s1182_s10 = smov [#allocation9]   ;;  %s94_s29 = ssub.s32 %s1178_s21, %s1285_s9 }
  0x3c   : > { %915 = dma.vmem_to_smem (!%p1278_p11), %s1282_s7, 16, %s1182_s10, [#allocation10]  }
  0x3d   : > { %s97_s11 = sadd.s32 1, %s1174_s20  ;;  %p95_p6 = scmp.eq.s32.totalorder %s94_s29, 0 }
  0x3e   : > { %p104_p9 = scmp.ne.s32.totalorder %s1174_s20, %s1170_s19  ;;  %p105_p13 = scmp.eq.s32.totalorder %s1178_s21, 0 }
  0x3f   : > { %p930_p0 = scmp.lt.s32.totalorder %s1178_s21, 2  ;;  %p1654_p5 = scmp.eq.s32.totalorder %s1244_s22, 1 }
  0x40   : > { %s1329_s8 = scalar_select %p95_p6, %s1174_s20, %s97_s11  }
  0x41   : > { %p106_p3 = por %p105_p13, %p104_p9  ;;  %p1333_p7 = por %p1654_p5, %p104_p9 }
  0x42   : > { %s1338_s13 = sand.u32 1, %s1174_s20   ;;  %s882_s7 = sshll.u32 %s1178_s21, 9 }
  0x43   : > { %s1655_s12 = scalar_select %p1333_p7, 1, 0 }
  0x44   : > { %s842_s14 = sshll.u32 %s1338_s13, 5  ;;  %s1347_s17 = scalar_lea.hbm %s1640_s3, %s882_s7 }
  0x45   : > { %s221_s23 = scalar_lea.vmem [#allocation11], %s842_s14  ;;  %p1351_p11 = pnand %p930_p0, %p106_p3 }
  0x46   : > { %s228_s27 = sshll.u32 %s221_s23, 4  ;;  %s218_s30 = scalar_lea.sflag [#allocation4], %s1338_s13  ;;  %s1355_s27 = int_to_ptr.vmem [resolvable:$true] %s228_s27 }
  0x47   : > { %s1036_s6 = scalar_lea.hbm %s1347_s17, 512  ;;  %p1038_p12 = pneg %p1351_p11 }
  0x48   : > { %p1037_p10 = scmp.ne.s32.totalorder %s1347_s17, %s1036_s6  ;;  %s1041_s11 = scalar_lea.hbm %s1640_s3, 1024 }
  0x49   : > { %p1042_p6 = scmp.lt.u32.totalorder %s1347_s17, %s1640_s3  ;;  %p1043_p9 = scmp.lt.u32.totalorder %s1041_s11, %s1036_s6 }
  0x4a   : > { %p1039_p1 = pnand %p1038_p12, %p1037_p10  ;;  %p1045_p0 = scmp.lt.u32.totalorder %s1036_s6, %s1347_s17 }
  0x4b   : > { %p1044_p13 = por %p1043_p9, %p1042_p6 }
  0x4c   : > { %p1040_p2 = pneg %p1039_p1 }
  0x4d   : > { %p1046_p3 = por %p1045_p0, %p1044_p13 }
  0x4f   : > { %p1047_p5 = pnand %p1046_p3, %p1040_p2 }
  0x51   : > { %1050 = shalt.err (!%p1047_p5)
}
  0x52   : > { %s1051_s23 = scalar_lea.vmem %s1355_s27, 512  ;;  %s1183_s10 = smov [#allocation11]  }
  0x53   : > { %p1052_p10 = scmp.ne.s32.totalorder %s1355_s27, %s1051_s23  ;;  %s1056_s29 = sshll.u32 %s1183_s10, 4  ;;  %s1057_s29 = int_to_ptr.vmem [resolvable:$false] %s1056_s29 }
  0x54   : > { %s1058_s15 = scalar_lea.vmem %s1057_s29, 1024  ;;  %p1059_p4 = scmp.lt.s32.totalorder %s1355_s27, %s1057_s29 }
  0x55   : > { %p1054_p1 = pnand %p1052_p10, %p1038_p12  ;;  %p1060_p6 = scmp.lt.s32.totalorder %s1058_s15, %s1051_s23 }
  0x57   : > { %p1055_p7 = pneg %p1054_p1  ;;  %p1061_p9 = por %p1060_p6, %p1059_p4 }
  0x59   : > { %p1062_p13 = pnand %p1061_p9, %p1055_p7 }
  0x5b   : > { %1065 = shalt.err (!%p1062_p13)
}
  0x5c   : > { %s1184_s6 = smov 128   ;;  %s1185_s11 = smov 8  }
  0x5d   : > { %919 = dma.hbm_to_vmem [thread:$0]  (!%p1351_p11), %s1347_s17, 512, %s1355_s27, %s218_s30, %s1184_s6, %s1184_s6, %s1185_s11  }
  0x5e   : > { %s1393_s10 = scalar_lea.hbm %s1641_s4, %s882_s7  ;;  %s242_s29 = scalar_lea.vmem [#allocation12], %s842_s14 }
  0x5f   : > { %s249_s15 = sshll.u32 %s242_s29, 4  ;;  %s239_s0 = scalar_lea.sflag [#allocation13], %s1338_s13  ;;  %s1397_s15 = int_to_ptr.vmem [resolvable:$true] %s249_s15 }
  0x60   : > { %s1066_s1 = scalar_lea.hbm %s1393_s10, 512  ;;  %s1071_s7 = scalar_lea.hbm %s1641_s4, 1024 }
  0x61   : > { %p1067_p4 = scmp.ne.s32.totalorder %s1393_s10, %s1066_s1  ;;  %p1072_p0 = scmp.lt.u32.totalorder %s1393_s10, %s1641_s4 }
  0x62   : > { %p1073_p3 = scmp.lt.u32.totalorder %s1071_s7, %s1066_s1  ;;  %p1075_p10 = scmp.lt.u32.totalorder %s1066_s1, %s1393_s10 }
  0x63   : > { %p1069_p7 = pnand %p1067_p4, %p1038_p12 }
  0x64   : > { %p1074_p5 = por %p1073_p3, %p1072_p0 }
  0x65   : > { %p1070_p2 = pneg %p1069_p7 }
  0x66   : > { %p1076_p1 = por %p1075_p10, %p1074_p5 }
  0x68   : > { %p1077_p6 = pnand %p1076_p1, %p1070_p2 }
  0x6a   : > { %1080 = shalt.err (!%p1077_p6)
}
  0x6b   : > { %s1081_s14 = scalar_lea.vmem %s1397_s15, 512  ;;  %s1186_s23 = smov [#allocation12]  }
  0x6c   : > { %p1082_p9 = scmp.ne.s32.totalorder %s1397_s15, %s1081_s14  ;;  %s1086_s29 = sshll.u32 %s1186_s23, 4  ;;  %s1087_s29 = int_to_ptr.vmem [resolvable:$false] %s1086_s29 }
  0x6d   : > { %s1088_s17 = scalar_lea.vmem %s1087_s29, 1024  ;;  %p1089_p7 = scmp.lt.s32.totalorder %s1397_s15, %s1087_s29 }
  0x6e   : > { %p1084_p13 = pnand %p1082_p9, %p1038_p12  ;;  %p1090_p0 = scmp.lt.s32.totalorder %s1088_s17, %s1081_s14 }
  0x70   : > { %p1085_p4 = pneg %p1084_p13  ;;  %p1091_p3 = por %p1090_p0, %p1089_p7 }
  0x72   : > { %p1092_p5 = pnand %p1091_p3, %p1085_p4 }
  0x74   : > { %1095 = shalt.err (!%p1092_p5)
}
  0x75   : > { %922 = dma.hbm_to_vmem [thread:$0]  (!%p1351_p11), %s1393_s10, 512, %s1397_s15, %s239_s0, %s1184_s6, %s1184_s6, %s1185_s11  }
  0x76   : > { %261 = sbr.rel (%p1263_p8) target bundleno = 536 (0x218), region = 40  ;;  %p1657_p12 = scmp.eq.s32.totalorder (!%p1263_p8), %s1244_s22, 0 }
  0x7d   : > { %1141 = dma.done.wait (%p1657_p12), [#allocation6], 16   ;;  %p1658_p2 = pmov %p1657_p12 }
  0x7f   : > { %1143 = vsyncadd (%p1658_p2), [#allocation6], 4294967280  ;;  %p1659_p10 = pmov %p1658_p2 }
  0x80   : > { %p1660_p1 = pmov %p1658_p2 }
  0x81   : > { %1145 = dma.done.wait (%p1659_p10), [#allocation7], 16  }
  0x82   : > { %1147 = vsyncadd (%p1660_p1), [#allocation7], 4294967280  ;;  %p1661_p6 = pmov %p1660_p1 }
  0x83   : > { %p1662_p11 = pmov %p1660_p1 }
  0x84   : > { %1149 = dma.done.wait (%p1661_p6), [#allocation10], 16  }
  0x85   : > { %1151 = vsyncadd (%p1662_p11), [#allocation10], 4294967280  ;;  %s1443_s0 = sand.u32 1, %s1170_s19   ;;  %p1663_p8 = scmp.ne.s32.totalorder %s1648_s24, 0 }
  0x86   : > { %s852_s1 = sshll.u32 %s1443_s0, 5  ;;  %s276_s26 = scalar_lea.sflag [#allocation4], %s1443_s0 }
  0x87   : > { %s279_s13 = scalar_lea.vmem [#allocation11], %s852_s1 }
  0x88   : > { %1153 = dma.done.wait (%p1663_p8), %s276_s26, 512  }
  0x89   : > { %1155 = vsyncadd (%p1663_p8), %s276_s26, 4294966784  ;;  %s285_s28 = scalar_lea.sflag [#allocation13], %s1443_s0  ;;  %s1452_s6 = scalar_lea.vmem [#allocation12], %s852_s1 }
  0x8a   : > { %1157 = dma.done.wait (%p1663_p8), %s285_s28, 512  }
  0x8b   : > { %1159 = vsyncadd (%p1663_p8), %s285_s28, 4294966784 }
  0x8c   : > { %293 = sfence }
  0x8d   : > { %v320_v0 = vlaneseq  ;;  %v327_v1 = vld [vmem:[%s279_s13] sm:$0xff]  ;;  %v328_v2 = vld [vmem:[%s279_s13 + $0x8] sm:$0xff]  ;;  %v329_v3 = vld [vmem:[%s279_s13 + $0x10] sm:$0xff]  ;;  %s1459_s11 = sshll.u32 %s1244_s22, 2  ;;  %v1187_v7 = vmov 0.0   ;;  %s319_s10 = scalar_lea.vmem [#allocation14], %s1443_s0 }
  0x8e   : > { %v330_v4 = vld [vmem:[%s279_s13 + $0x18] sm:$0xff]  ;;  %v854_v5 = vmul.f32 -1.442695, %v327_v1  ;;  %v855_v6 = vmul.f32 -1.442695, %v328_v2  ;;  %367 = vst [vmem:[#allocation2] sm:$0xff] %v1187_v7 }
  0x8f   : > { %368 = vst [vmem:[#allocation2 + $0x8] sm:$0xff] %v1187_v7  ;;  %369 = vst [vmem:[#allocation2 + $0x10] sm:$0xff] %v1187_v7  ;;  %v1461_v8 = vshrl.u32 %v320_v0, 7  ;;  %v1463_v9 = vand.u32 127, %v320_v0  ;;  %v856_v10 = vmul.f32 -1.442695, %v329_v3 }
  0x90   : > { %370 = vst [vmem:[#allocation2 + $0x18] sm:$0xff] %v1187_v7  ;;  %v857_v11 = vmul.f32 -1.442695, %v330_v4  ;;  %977 = vpow2.f32 %v854_v5  ;;  %s1466_s24 = sld [smem:[#allocation9 + %s1459_s11]]  ;;  %v355_v23 = vld [vmem:[%s1452_s6] sm:$0xff]  ;;  %v356_v24 = vld [vmem:[%s1452_s6 + $0x8] sm:$0xff] }
  0x91   : > { %v1469_v12 = vadd.s32 8, %v1461_v8  ;;  %v1472_v13 = vadd.s32 16, %v1461_v8  ;;  %v1475_v14 = vadd.s32 24, %v1461_v8  ;;  %979 = vpow2.f32 %v855_v6  ;;  %v357_v26 = vld [vmem:[%s1452_s6 + $0x10] sm:$0xff]  ;;  %v358_v28 = vld [vmem:[%s1452_s6 + $0x18] sm:$0xff] }
  0x92   : > { %981 = vpow2.f32 %v856_v10 }
  0x93   : > { %983 = vpow2.f32 %v857_v11 }
  0x96   : > { %p373_p9 = scmp.ne.f32.partialorder %s1466_s24, 0.0 }
  0x97   : > { %s377_s15 = sld [smem:[#allocation3 + %s1459_s11]] (%p373_p9)  ;;  %v424_v40 = vstv (%p373_p9), %s1466_s24  ;;  %v1188_v43 = vmov (%p373_p9), 0.0   ;;  %v412_v52 = vld [vmem:[#allocation2] sm:$0xff] (%p373_p9)  ;;  %v413_v54 = vld [vmem:[#allocation2 + $0x8] sm:$0xff] (%p373_p9)  ;;  %v414_v55 = vld [vmem:[#allocation2 + $0x10] sm:$0xff] (%p373_p9) }
  0x98   : > { %s1495_s27 = sld [smem:[#allocation8 + %s1459_s11]] (%p373_p9)  ;;  %v415_v60 = vld [vmem:[#allocation2 + $0x18] sm:$0xff] (%p373_p9) }
  0x9a   : > { %v978_v15 = vpop.eup %977 }
  0x9b   : > { %v980_v16 = vpop.eup %979  ;;  %v343_v17 = vadd.f32 1.0, %v978_v15 }
  0x9c   : > { %v982_v18 = vpop.eup %981  ;;  %v344_v19 = vadd.f32 1.0, %v980_v16 }
  0x9d   : > { %v984_v20 = vpop.eup %983  ;;  %v345_v21 = vadd.f32 1.0, %v982_v18  ;;  %985 = vrcp.f32 %v343_v17  ;;  %p379_p13 = scmp.lt.s32.totalorder (%p373_p9), %s377_s15, 5  ;;  %s381_s7 = ssub.s32 (%p373_p9), 64, %s377_s15 }
  0x9e   : > { %v346_v22 = vadd.f32 1.0, %v984_v20  ;;  %987 = vrcp.f32 %v344_v19  ;;  %p382_p4 = scmp.lt.s32.totalorder (%p373_p9), %s381_s7, 6  ;;  %p384_p7 = scmp.lt.s32.totalorder (%p373_p9), %s1495_s27, 5 }
  0x9f   : > { %989 = vrcp.f32 %v345_v21  ;;  %s386_s14 = ssub.s32 (%p373_p9), 32, %s1495_s27 }
  0xa0   : > { %991 = vrcp.f32 %v346_v22  ;;  %p387_p0 = scmp.lt.s32.totalorder (%p373_p9), %s386_s14, 6 }
  0xa7   : > { %v986_v25 = vpop.eup %985  ;;  %376 = sbr.rel (!%p373_p9) target bundleno = 192 (0xc0), region = 64 }
  0xa8   : > { %v988_v27 = vpop.eup %987  ;;  %v359_v29 = vsub.f32 %v986_v25, %v355_v23 }
  0xa9   : > { %v990_v30 = vpop.eup %989  ;;  %v360_v31 = vsub.f32 %v988_v27, %v356_v24 }
  0xaa   : > { %v992_v32 = vpop.eup %991  ;;  %v361_v33 = vsub.f32 %v990_v30, %v357_v26  ;;  %v1482_v34 = vand.u32 2147483647, %v359_v29 }
  0xab   : > { %v362_v35 = vsub.f32 %v992_v32, %v358_v28  ;;  %v1484_v36 = vand.u32 2147483647, %v360_v31 }
  0xac   : > { %v1486_v37 = vand.u32 2147483647, %v361_v33 }
  0xad   : > { %v1488_v38 = vand.u32 2147483647, %v362_v35 }
  0xae   : > { %s380_s30 = scalar_select %p379_p13, %s377_s15, 5 }
  0xaf   : > { %s1672_s7 = smov (!%p382_p4, %s381_s7), 6  ;;  %s1674_s14 = smov (!%p387_p0, %s386_s14), 6 }
  0xb0   : > { %s385_s16 = scalar_select %p384_p7, %s1495_s27, 5 }
  0xb1   : > { %s389_s23 = ssub.s32 %s377_s15, %s380_s30  ;;  %s395_s29 = sadd.s32 %s1672_s7, %s377_s15 }
  0xb2   : > { %v390_v39 = vstv %s389_s23  ;;  %v396_v41 = vstv %s395_s29  ;;  %s405_s17 = ssub.s32 %s1495_s27, %s385_s16  ;;  %s408_s1 = sadd.s32 %s1674_s14, %s1495_s27 }
  0xb3   : > { %vm391_vm0 = vcmp.ge.s32.totalorder %v1461_v8, %v390_v39  ;;  %vm392_vm1 = vcmp.ge.s32.totalorder %v1469_v12, %v390_v39  ;;  %vm393_vm2 = vcmp.ge.s32.totalorder %v1472_v13, %v390_v39  ;;  %vm397_vm3 = vcmp.lt.s32.totalorder %v1461_v8, %v396_v41 }
  0xb4   : > { %v406_v42 = vstv %s405_s17  ;;  %vm398_vm4 = vcmp.lt.s32.totalorder %v1469_v12, %v396_v41  ;;  %vm399_vm5 = vcmp.lt.s32.totalorder %v1472_v13, %v396_v41  ;;  %vm401_vm6 = vmand %vm391_vm0, %vm397_vm3  ;;  %vm394_vm7 = vcmp.ge.s32.totalorder %v1475_v14, %v390_v39 }
  0xb5   : > { %vm400_vm8 = vcmp.lt.s32.totalorder %v1475_v14, %v396_v41  ;;  %vm407_vm9 = vcmp.ge.s32.totalorder %v1463_v9, %v406_v42  ;;  %v859_v44 = vsel %vm401_vm6, 1.0, %v1188_v43  ;;  %vm402_vm10 = vmand %vm392_vm1, %vm398_vm4  ;;  %v409_v45 = vstv %s408_s1 }
  0xb6   : > { %v425_v46 = vmul.f32 %v859_v44, %v424_v40  ;;  %v860_v47 = vsel %vm402_vm10, 1.0, %v1188_v43  ;;  %vm403_vm11 = vmand %vm393_vm2, %vm399_vm5  ;;  %vm410_vm12 = vcmp.lt.s32.totalorder %v1463_v9, %v409_v45 }
  0xb7   : > { %v426_v48 = vmul.f32 %v860_v47, %v424_v40  ;;  %v861_v49 = vsel %vm403_vm11, 1.0, %v1188_v43  ;;  %vm404_vm13 = vmand %vm394_vm7, %vm400_vm8 }
  0xb8   : > { %vm411_vm14 = vmand %vm407_vm9, %vm410_vm12  ;;  %v427_v50 = vmul.f32 %v861_v49, %v424_v40  ;;  %v862_v51 = vsel %vm404_vm13, 1.0, %v1188_v43 }
  0xb9   : > { %v863_v53 = vsel %vm411_vm14, 1.0, %v1188_v43  ;;  %v428_v56 = vmul.f32 %v862_v51, %v424_v40 }
  0xba   : > { %v431_v57 = vmul.f32 %v863_v53, %v425_v46  ;;  %v432_v58 = vmul.f32 %v863_v53, %v426_v48  ;;  %v433_v59 = vmul.f32 %v863_v53, %v427_v50 }
  0xbb   : > { %v434_v61 = vmul.f32 %v863_v53, %v428_v56 }
  0xbc   : > { %v435_v62 = vadd.f32 %v431_v57, %v412_v52  ;;  %v436_v63 = vadd.f32 %v432_v58, %v413_v54  ;;  %v437_v0 = vadd.f32 %v433_v59, %v414_v55 }
  0xbd   : > { %v438_v1 = vadd.f32 %v434_v61, %v415_v60 }
  0xbe   : > { %439 = vst [vmem:[#allocation2] sm:$0xff] %v435_v62  ;;  %440 = vst [vmem:[#allocation2 + $0x8] sm:$0xff] %v436_v63 }
  0xbf   : > { %441 = vst [vmem:[#allocation2 + $0x10] sm:$0xff] %v437_v0  ;;  %442 = vst [vmem:[#allocation2 + $0x18] sm:$0xff] %v438_v1 }
  0xc0 PF: > { %s443_s26 = sadd.s32 1, %s1459_s11 }
  0xc1   : > { %s444_s13 = sld [smem:[#allocation9 + %s443_s26]] }
  0xc7   : > { %p445_p3 = scmp.ne.f32.partialorder %s444_s13, 0.0 }
  0xc8   : > { %s449_s28 = sld [smem:[#allocation3 + %s443_s26]] (%p445_p3)  ;;  %v496_v3 = vstv (%p445_p3), %s444_s13  ;;  %v1189_v6 = vmov (%p445_p3), 0.0   ;;  %v484_v20 = vld [vmem:[#allocation2] sm:$0xff] (%p445_p3)  ;;  %v485_v22 = vld [vmem:[#allocation2 + $0x8] sm:$0xff] (%p445_p3)  ;;  %v486_v23 = vld [vmem:[#allocation2 + $0x10] sm:$0xff] (%p445_p3) }
  0xc9   : > { %448 = sbr.rel (!%p445_p3) target bundleno = 227 (0xe3), region = 68  ;;  %s1516_s6 = sld [smem:[#allocation8 + %s443_s26]] (%p445_p3)  ;;  %v487_v28 = vld [vmem:[#allocation2 + $0x18] sm:$0xff] (%p445_p3) }
  0xce   : > { %p451_p5 = scmp.lt.s32.totalorder (%p445_p3), %s449_s28, 5  ;;  %s453_s24 = ssub.s32 (%p445_p3), 64, %s449_s28 }
  0xcf   : > { %p454_p12 = scmp.lt.s32.totalorder (%p445_p3), %s453_s24, 6  ;;  %p456_p2 = scmp.lt.s32.totalorder (%p445_p3), %s1516_s6, 5 }
  0xd0   : > { %s452_s15 = scalar_select %p451_p5, %s449_s28, 5 }
  0xd1   : > { %s1676_s24 = smov (!%p454_p12, %s453_s24), 6  ;;  %s458_s7 = ssub.s32 32, %s1516_s6 }
  0xd2   : > { %s457_s27 = scalar_select %p456_p2, %s1516_s6, 5 }
  0xd3   : > { %s461_s30 = ssub.s32 %s449_s28, %s452_s15  ;;  %p459_p10 = scmp.lt.s32.totalorder %s458_s7, 6 }
  0xd4   : > { %v462_v2 = vstv %s461_s30  ;;  %s467_s16 = sadd.s32 %s1676_s24, %s449_s28  ;;  %s477_s14 = ssub.s32 %s1516_s6, %s457_s27 }
  0xd5   : > { %vm463_vm15 = vcmp.ge.s32.totalorder %v1461_v8, %v462_v2  ;;  %v468_v4 = vstv %s467_s16  ;;  %vm464_vm0 = vcmp.ge.s32.totalorder %v1469_v12, %v462_v2  ;;  %vm465_vm1 = vcmp.ge.s32.totalorder %v1472_v13, %v462_v2  ;;  %s1678_s7 = smov (!%p459_p10, %s458_s7), 6 }
  0xd6   : > { %vm469_vm2 = vcmp.lt.s32.totalorder %v1461_v8, %v468_v4  ;;  %v478_v5 = vstv %s477_s14  ;;  %vm470_vm3 = vcmp.lt.s32.totalorder %v1469_v12, %v468_v4  ;;  %vm471_vm4 = vcmp.lt.s32.totalorder %v1472_v13, %v468_v4  ;;  %s480_s23 = sadd.s32 %s1678_s7, %s1516_s6 }
  0xd7   : > { %vm473_vm5 = vmand %vm463_vm15, %vm469_vm2  ;;  %vm466_vm6 = vcmp.ge.s32.totalorder %v1475_v14, %v462_v2  ;;  %vm472_vm7 = vcmp.lt.s32.totalorder %v1475_v14, %v468_v4  ;;  %vm479_vm8 = vcmp.ge.s32.totalorder %v1463_v9, %v478_v5  ;;  %v481_v10 = vstv %s480_s23 }
  0xd8   : > { %v864_v7 = vsel %vm473_vm5, 1.0, %v1189_v6  ;;  %vm474_vm9 = vmand %vm464_vm0, %vm470_vm3  ;;  %vm482_vm11 = vcmp.lt.s32.totalorder %v1463_v9, %v481_v10 }
  0xd9   : > { %v497_v11 = vmul.f32 %v864_v7, %v496_v3  ;;  %v865_v15 = vsel %vm474_vm9, 1.0, %v1189_v6  ;;  %vm475_vm10 = vmand %vm465_vm1, %vm471_vm4 }
  0xda   : > { %v498_v16 = vmul.f32 %v865_v15, %v496_v3  ;;  %v866_v17 = vsel %vm475_vm10, 1.0, %v1189_v6  ;;  %vm476_vm12 = vmand %vm466_vm6, %vm472_vm7 }
  0xdb   : > { %vm483_vm13 = vmand %vm479_vm8, %vm482_vm11  ;;  %v499_v18 = vmul.f32 %v866_v17, %v496_v3  ;;  %v867_v19 = vsel %vm476_vm12, 1.0, %v1189_v6 }
  0xdc   : > { %v868_v21 = vsel %vm483_vm13, 1.0, %v1189_v6  ;;  %v500_v24 = vmul.f32 %v867_v19, %v496_v3 }
  0xdd   : > { %v503_v25 = vmul.f32 %v868_v21, %v497_v11  ;;  %v504_v26 = vmul.f32 %v868_v21, %v498_v16  ;;  %v505_v27 = vmul.f32 %v868_v21, %v499_v18 }
  0xde   : > { %v506_v29 = vmul.f32 %v868_v21, %v500_v24 }
  0xdf   : > { %v507_v30 = vadd.f32 %v503_v25, %v484_v20  ;;  %v508_v31 = vadd.f32 %v504_v26, %v485_v22  ;;  %v509_v32 = vadd.f32 %v505_v27, %v486_v23 }
  0xe0   : > { %v510_v33 = vadd.f32 %v506_v29, %v487_v28 }
  0xe1   : > { %511 = vst [vmem:[#allocation2] sm:$0xff] %v507_v30  ;;  %512 = vst [vmem:[#allocation2 + $0x8] sm:$0xff] %v508_v31 }
  0xe2   : > { %513 = vst [vmem:[#allocation2 + $0x10] sm:$0xff] %v509_v32  ;;  %514 = vst [vmem:[#allocation2 + $0x18] sm:$0xff] %v510_v33 }
  0xe3 PF: > { %s515_s29 = sadd.s32 2, %s1459_s11 }
  0xe4   : > { %s516_s17 = sld [smem:[#allocation9 + %s515_s29]] }
  0xea   : > { %p517_p1 = scmp.ne.f32.partialorder %s516_s17, 0.0 }
  0xeb   : > { %s521_s1 = sld [smem:[#allocation3 + %s515_s29]] (%p517_p1)  ;;  %v568_v39 = vstv (%p517_p1), %s516_s17  ;;  %v1190_v42 = vmov (%p517_p1), 0.0   ;;  %v556_v51 = vld [vmem:[#allocation2] sm:$0xff] (%p517_p1)  ;;  %v557_v53 = vld [vmem:[#allocation2 + $0x8] sm:$0xff] (%p517_p1)  ;;  %v558_v54 = vld [vmem:[#allocation2 + $0x10] sm:$0xff] (%p517_p1) }
  0xec   : > { %520 = sbr.rel (!%p517_p1) target bundleno = 262 (0x106), region = 72  ;;  %s1536_s26 = sld [smem:[#allocation8 + %s515_s29]] (%p517_p1)  ;;  %v559_v59 = vld [vmem:[#allocation2 + $0x18] sm:$0xff] (%p517_p1) }
  0xf1   : > { %p523_p6 = scmp.lt.s32.totalorder (%p517_p1), %s521_s1, 5  ;;  %s525_s13 = ssub.s32 (%p517_p1), 64, %s521_s1 }
  0xf2   : > { %p526_p11 = scmp.lt.s32.totalorder (%p517_p1), %s525_s13, 6  ;;  %p528_p8 = scmp.lt.s32.totalorder (%p517_p1), %s1536_s26, 5 }
  0xf3   : > { %s524_s28 = scalar_select %p523_p6, %s521_s1, 5 }
  0xf4   : > { %s1680_s13 = smov (!%p526_p11, %s525_s13), 6  ;;  %s530_s24 = ssub.s32 32, %s1536_s26 }
  0xf5   : > { %s529_s6 = scalar_select %p528_p8, %s1536_s26, 5 }
  0xf6   : > { %s533_s15 = ssub.s32 %s521_s1, %s524_s28  ;;  %p531_p9 = scmp.lt.s32.totalorder %s530_s24, 6 }
  0xf7   : > { %v534_v35 = vstv %s533_s15  ;;  %s539_s27 = sadd.s32 %s1680_s13, %s521_s1  ;;  %s549_s7 = ssub.s32 %s1536_s26, %s529_s6 }
  0xf8   : > { %vm535_vm14 = vcmp.ge.s32.totalorder %v1461_v8, %v534_v35  ;;  %v540_v40 = vstv %s539_s27  ;;  %vm536_vm15 = vcmp.ge.s32.totalorder %v1469_v12, %v534_v35  ;;  %vm537_vm0 = vcmp.ge.s32.totalorder %v1472_v13, %v534_v35  ;;  %s1682_s24 = smov (!%p531_p9, %s530_s24), 6 }
  0xf9   : > { %vm541_vm1 = vcmp.lt.s32.totalorder %v1461_v8, %v540_v40  ;;  %v550_v41 = vstv %s549_s7  ;;  %vm542_vm2 = vcmp.lt.s32.totalorder %v1469_v12, %v540_v40  ;;  %vm543_vm3 = vcmp.lt.s32.totalorder %v1472_v13, %v540_v40  ;;  %s552_s30 = sadd.s32 %s1682_s24, %s1536_s26 }
  0xfa   : > { %vm545_vm4 = vmand %vm535_vm14, %vm541_vm1  ;;  %vm538_vm5 = vcmp.ge.s32.totalorder %v1475_v14, %v534_v35  ;;  %vm544_vm6 = vcmp.lt.s32.totalorder %v1475_v14, %v540_v40  ;;  %vm551_vm7 = vcmp.ge.s32.totalorder %v1463_v9, %v550_v41  ;;  %v553_v44 = vstv %s552_s30 }
  0xfb   : > { %v869_v43 = vsel %vm545_vm4, 1.0, %v1190_v42  ;;  %vm546_vm8 = vmand %vm536_vm15, %vm542_vm2  ;;  %vm554_vm10 = vcmp.lt.s32.totalorder %v1463_v9, %v553_v44 }
  0xfc   : > { %v569_v45 = vmul.f32 %v869_v43, %v568_v39  ;;  %v870_v46 = vsel %vm546_vm8, 1.0, %v1190_v42  ;;  %vm547_vm9 = vmand %vm537_vm0, %vm543_vm3 }
  0xfd   : > { %v570_v47 = vmul.f32 %v870_v46, %v568_v39  ;;  %v871_v48 = vsel %vm547_vm9, 1.0, %v1190_v42  ;;  %vm548_vm11 = vmand %vm538_vm5, %vm544_vm6 }
  0xfe   : > { %vm555_vm12 = vmand %vm551_vm7, %vm554_vm10  ;;  %v571_v49 = vmul.f32 %v871_v48, %v568_v39  ;;  %v872_v50 = vsel %vm548_vm11, 1.0, %v1190_v42 }
  0xff   : > { %v873_v52 = vsel %vm555_vm12, 1.0, %v1190_v42  ;;  %v572_v55 = vmul.f32 %v872_v50, %v568_v39 }
 0x100   : > { %v575_v56 = vmul.f32 %v873_v52, %v569_v45  ;;  %v576_v57 = vmul.f32 %v873_v52, %v570_v47  ;;  %v577_v58 = vmul.f32 %v873_v52, %v571_v49 }
 0x101   : > { %v578_v60 = vmul.f32 %v873_v52, %v572_v55 }
 0x102   : > { %v579_v61 = vadd.f32 %v575_v56, %v556_v51  ;;  %v580_v62 = vadd.f32 %v576_v57, %v557_v53  ;;  %v581_v63 = vadd.f32 %v577_v58, %v558_v54 }
 0x103   : > { %v582_v0 = vadd.f32 %v578_v60, %v559_v59 }
 0x104   : > { %583 = vst [vmem:[#allocation2] sm:$0xff] %v579_v61  ;;  %584 = vst [vmem:[#allocation2 + $0x8] sm:$0xff] %v580_v62 }
 0x105   : > { %585 = vst [vmem:[#allocation2 + $0x10] sm:$0xff] %v581_v63  ;;  %586 = vst [vmem:[#allocation2 + $0x18] sm:$0xff] %v582_v0 }
 0x106 PF: > { %s587_s16 = sadd.s32 3, %s1459_s11 }
 0x107   : > { %s588_s14 = sld [smem:[#allocation9 + %s587_s16]] }
 0x10d   : > { %p589_p13 = scmp.ne.f32.partialorder %s588_s14, 0.0 }
 0x10e   : > { %s593_s23 = sld [smem:[#allocation3 + %s587_s16]] (%p589_p13)  ;;  %v640_v2 = vstv (%p589_p13), %s588_s14  ;;  %v1191_v5 = vmov (%p589_p13), 0.0   ;;  %v628_v16 = vld [vmem:[#allocation2] sm:$0xff] (%p589_p13)  ;;  %v629_v18 = vld [vmem:[#allocation2 + $0x8] sm:$0xff] (%p589_p13)  ;;  %v630_v19 = vld [vmem:[#allocation2 + $0x10] sm:$0xff] (%p589_p13) }
 0x10f   : > { %592 = sbr.rel (!%p589_p13) target bundleno = 297 (0x129), region = 76  ;;  %s1556_s29 = sld [smem:[#allocation8 + %s587_s16]] (%p589_p13)  ;;  %v631_v24 = vld [vmem:[#allocation2 + $0x18] sm:$0xff] (%p589_p13) }
 0x114   : > { %p595_p4 = scmp.lt.s32.totalorder (%p589_p13), %s593_s23, 5  ;;  %s597_s17 = ssub.s32 (%p589_p13), 64, %s593_s23 }
 0x115   : > { %p598_p7 = scmp.lt.s32.totalorder (%p589_p13), %s597_s17, 6  ;;  %p600_p0 = scmp.lt.s32.totalorder (%p589_p13), %s1556_s29, 5 }
 0x116   : > { %s596_s1 = scalar_select %p595_p4, %s593_s23, 5 }
 0x117   : > { %s1684_s17 = smov (!%p598_p7, %s597_s17), 6  ;;  %s602_s13 = ssub.s32 32, %s1556_s29 }
 0x118   : > { %s601_s26 = scalar_select %p600_p0, %s1556_s29, 5 }
 0x119   : > { %s605_s28 = ssub.s32 %s593_s23, %s596_s1  ;;  %p603_p3 = scmp.lt.s32.totalorder %s602_s13, 6 }
 0x11a   : > { %v606_v1 = vstv %s605_s28  ;;  %s611_s11 = sadd.s32 %s1684_s17, %s593_s23  ;;  %s621_s6 = ssub.s32 %s1556_s29, %s601_s26 }
 0x11b   : > { %vm607_vm13 = vcmp.ge.s32.totalorder %v1461_v8, %v606_v1  ;;  %v612_v3 = vstv %s611_s11  ;;  %vm608_vm14 = vcmp.ge.s32.totalorder %v1469_v12, %v606_v1  ;;  %vm609_vm15 = vcmp.ge.s32.totalorder %v1472_v13, %v606_v1  ;;  %s1686_s13 = smov (!%p603_p3, %s602_s13), 6 }
 0x11c   : > { %vm613_vm0 = vcmp.lt.s32.totalorder %v1461_v8, %v612_v3  ;;  %v622_v4 = vstv %s621_s6  ;;  %vm614_vm1 = vcmp.lt.s32.totalorder %v1469_v12, %v612_v3  ;;  %vm615_vm2 = vcmp.lt.s32.totalorder %v1472_v13, %v612_v3  ;;  %s624_s24 = sadd.s32 %s1686_s13, %s1556_s29 }
 0x11d   : > { %vm617_vm3 = vmand %vm607_vm13, %vm613_vm0  ;;  %vm610_vm4 = vcmp.ge.s32.totalorder %v1475_v14, %v606_v1  ;;  %vm616_vm5 = vcmp.lt.s32.totalorder %v1475_v14, %v612_v3  ;;  %vm623_vm6 = vcmp.ge.s32.totalorder %v1463_v9, %v622_v4  ;;  %v625_v7 = vstv %s624_s24 }
 0x11e   : > { %v874_v6 = vsel %vm617_vm3, 1.0, %v1191_v5  ;;  %vm618_vm7 = vmand %vm608_vm14, %vm614_vm1  ;;  %vm626_vm9 = vcmp.lt.s32.totalorder %v1463_v9, %v625_v7 }
 0x11f   : > { %v641_v10 = vmul.f32 %v874_v6, %v640_v2  ;;  %v875_v11 = vsel %vm618_vm7, 1.0, %v1191_v5  ;;  %vm619_vm8 = vmand %vm609_vm15, %vm615_vm2 }
 0x120   : > { %v642_v8 = vmul.f32 %v875_v11, %v640_v2  ;;  %v876_v12 = vsel %vm619_vm8, 1.0, %v1191_v5  ;;  %vm620_vm10 = vmand %vm610_vm4, %vm616_vm5 }
 0x121   : > { %vm627_vm11 = vmand %vm623_vm6, %vm626_vm9  ;;  %v643_v15 = vmul.f32 %v876_v12, %v640_v2  ;;  %v877_v14 = vsel %vm620_vm10, 1.0, %v1191_v5 }
 0x122   : > { %v878_v17 = vsel %vm627_vm11, 1.0, %v1191_v5  ;;  %v644_v20 = vmul.f32 %v877_v14, %v640_v2 }
 0x123   : > { %v647_v21 = vmul.f32 %v878_v17, %v641_v10  ;;  %v648_v22 = vmul.f32 %v878_v17, %v642_v8  ;;  %v649_v23 = vmul.f32 %v878_v17, %v643_v15 }
 0x124   : > { %v650_v25 = vmul.f32 %v878_v17, %v644_v20 }
 0x125   : > { %v651_v13 = vadd.f32 %v647_v21, %v628_v16  ;;  %v652_v26 = vadd.f32 %v648_v22, %v629_v18  ;;  %v653_v27 = vadd.f32 %v649_v23, %v630_v19 }
 0x126   : > { %v654_v28 = vadd.f32 %v650_v25, %v631_v24 }
 0x127   : > { %655 = vst [vmem:[#allocation2] sm:$0xff] %v651_v13  ;;  %656 = vst [vmem:[#allocation2 + $0x8] sm:$0xff] %v652_v26 }
 0x128   : > { %657 = vst [vmem:[#allocation2 + $0x10] sm:$0xff] %v653_v27  ;;  %658 = vst [vmem:[#allocation2 + $0x18] sm:$0xff] %v654_v28 }
 0x129 PF: > { %v680_v40 = vadd.f32 %v1484_v36, %v1482_v34  ;;  %s879_s15 = sshll.u32 %s1244_s22, 4  ;;  %vm694_vm12 = vcmp.eq.s32.totalorder %v1463_v9, 1  ;;  %s713_s7 = sshll.u32 %s319_s10, 4  ;;  %vm693_vm13 = vcmp.eq.s32.totalorder %v1463_v9, 0  ;;  %s1593_s7 = int_to_ptr.vmem [resolvable:$true] %s713_s7 }
 0x12a   : > { %s1591_s23 = scalar_lea.hbm %s1642_s5, %s879_s15  ;;  %s701_s22 = scalar_lea.sflag [#allocation5], %s1443_s0 }
 0x12b   : > { %v681_v44 = vadd.f32 %v680_v40, %v1486_v37  ;;  %s1096_s29 = scalar_lea.vmem %s1593_s7, 16  ;;  %p1664_p12 = scmp.ne.s32.totalorder %s1655_s12, 0 }
 0x12c   : > { %p1097_p5 = scmp.ne.s32.totalorder %s1593_s7, %s1096_s29  ;;  %s1192_s17 = smov [#allocation14]  }
 0x12d   : > { %v682_v46 = vadd.f32 %v681_v44, %v1488_v38  ;;  %s1100_s1 = sshll.u32 %s1192_s17, 4  ;;  %s1101_s1 = int_to_ptr.vmem [resolvable:$false] %s1100_s1 }
 0x12e   : > { %v659_v29 = vld [vmem:[#allocation2] sm:$0xff]  ;;  %v660_v30 = vld [vmem:[#allocation2 + $0x8] sm:$0xff]  ;;  %p1098_p2 = pnand %p1097_p5, %p1664_p12  ;;  %s1102_s26 = scalar_lea.vmem %s1101_s1, 32 }
 0x12f   : > { %v661_v31 = vld [vmem:[#allocation2 + $0x10] sm:$0xff]  ;;  %v662_v32 = vld [vmem:[#allocation2 + $0x18] sm:$0xff]  ;;  %v663_v33 = vmul.f32 %v659_v29, %v1482_v34  ;;  %v664_v35 = vmul.f32 %v660_v30, %v1484_v36  ;;  %p1103_p1 = scmp.lt.s32.totalorder %s1593_s7, %s1101_s1  ;;  %p1104_p6 = scmp.lt.s32.totalorder %s1102_s26, %s1096_s29 }
 0x130   : > { %v665_v39 = vmul.f32 %v661_v31, %v1486_v37  ;;  %v666_v41 = vmul.f32 %v662_v32, %v1488_v38  ;;  %p1099_p10 = pneg %p1098_p2 }
 0x131   : > { %v667_v42 = vadd.f32 %v664_v35, %v663_v33  ;;  %p1105_p11 = por %p1104_p6, %p1103_p1 }
 0x133   : > { %v668_v43 = vadd.f32 %v667_v42, %v665_v39  ;;  %p1106_p8 = pnand %p1105_p11, %p1099_p10 }
 0x135   : > { %v669_v45 = vadd.f32 %v668_v43, %v666_v41 }
 0x137   : > { %670 = vadd.xlane.f32.xlu0 %v669_v45 }
 0x13b   : > { %683 = vadd.xlane.f32.xlu0 %v682_v46 }
 0x1c4   : > { %v671_v47 = vpop.xlane.xlu0 %670 }
 0x1c5   : > { %v672_v48 = vrot.slane %v671_v47, 4 }
 0x1c7   : > { %v673_v49 = vadd.f32 %v672_v48, %v671_v47 }
 0x1c8   : > { %v684_v50 = vpop.xlane.xlu0 %683 }
 0x1c9   : > { %v674_v51 = vrot.slane %v673_v49, 2  ;;  %v685_v52 = vrot.slane %v684_v50, 4 }
 0x1cb   : > { %v686_v34 = vadd.f32 %v685_v52, %v684_v50  ;;  %v675_v36 = vadd.f32 %v674_v51, %v673_v49 }
 0x1cd   : > { %v687_v53 = vrot.slane %v686_v34, 2  ;;  %v676_v54 = vrot.slane %v675_v36, 1 }
 0x1cf   : > { %v688_v55 = vadd.f32 %v687_v53, %v686_v34  ;;  %v677_v56 = vadd.f32 %v676_v54, %v675_v36 }
 0x1d1   : > { %884 = vpush %v677_v56  ;;  %v689_v37 = vrot.slane %v688_v55, 1 }
 0x1d3   : > { %v690_v38 = vadd.f32 %v689_v37, %v688_v55 }
 0x1d5   : > { %886 = vpush %v690_v38 }
 0x202   : > { %s885_s27 = spop %884 }
 0x203   : > { %v697_v58 = vstv %s885_s27 }
 0x206   : > { %s887_s30 = spop %886 }
 0x207   : > { %v695_v57 = vstv %s887_s30 }
 0x208   : > { %v696_v59 = vsel %vm694_vm12, %v695_v57, 0.0 }
 0x209   : > { %v698_v60 = vsel %vm693_vm13, %v697_v58, %v696_v59 }
 0x20a   : > { %699 = vst [vmem:[%s319_s10] sm:$0x1] %v698_v60 }
 0x20b   : > { %1109 = shalt.err (!%p1106_p8)
}
 0x20c   : > { %s1110_s0 = scalar_lea.hbm %s1591_s23, 16  ;;  %s1114_s28 = scalar_lea.hbm %s1642_s5, 32 }
 0x20d   : > { %p1111_p9 = scmp.ne.s32.totalorder %s1591_s23, %s1110_s0  ;;  %p1115_p7 = scmp.lt.u32.totalorder %s1591_s23, %s1642_s5 }
 0x20e   : > { %p1116_p0 = scmp.lt.u32.totalorder %s1114_s28, %s1110_s0  ;;  %p1118_p5 = scmp.lt.u32.totalorder %s1110_s0, %s1591_s23 }
 0x20f   : > { %p1112_p13 = pnand %p1111_p9, %p1664_p12 }
 0x210   : > { %p1117_p3 = por %p1116_p0, %p1115_p7 }
 0x211   : > { %p1113_p4 = pneg %p1112_p13 }
 0x212   : > { %p1119_p2 = por %p1118_p5, %p1117_p3 }
 0x214   : > { %p1120_p10 = pnand %p1119_p2, %p1113_p4 }
 0x216   : > { %1123 = shalt.err (!%p1120_p10)
}
 0x217   : > { %904 = dma.vmem_to_hbm [thread:$0]  (%p1664_p12), %s1593_s7, 16, %s1591_s23, %s701_s22  }
 0x218 PF: > { %s725_s24 = sand.u32 1, %s1166_s18   ;;  %p1665_p1 = scmp.ne.s32.totalorder %s1649_s25, 0 }
 0x219   : > { %p1666_p6 = scmp.ge.s32.totalorder %s1178_s21, 2  ;;  %s726_s15 = scalar_lea.sflag [#allocation5], %s725_s24 }
 0x21b   : > { %p924_p11 = pnand %p1666_p6, %p1665_p1 }
 0x21d   : > { %1161 = dma.done.wait (!%p924_p11), %s726_s15, 16  }
 0x21e   : > { %1163 = vsyncadd (!%p924_p11), %s726_s15, 4294967280  ;;  %p24_p8 = scmp.ge.s32.totalorder %s1285_s9, 4   ;;  %s1667_s18 = smov %s1170_s19 }
 0x21f   : > { %s1668_s19 = smov %s1174_s20  ;;  %s1669_s20 = smov %s1329_s8 }
 0x220   : > { %s1670_s21 = smov %s1285_s9  ;;  %26 = sbr.rel (!%p24_p8) target bundleno = 13 (0xd), region = 128 }
 0x227   :  { %730 = vsyncpa [#allocation4], 1 }
 0x228   :  { %732 = vsyncpa [#allocation4 + $0x1], 1 }
 0x229   :  { %733 = vsyncpa [#allocation13], 1 }
 0x22a   :  { %735 = vsyncpa [#allocation13 + $0x1], 1 }
 0x22b   :  { %736 = vsyncpa [#allocation5], 1 }
 0x22c   :  { %738 = vsyncpa [#allocation5 + $0x1], 1 }
 0x22d   :  { %739 = vsyncpa [#allocation6], 1 }
 0x22e   :  { %741 = vsyncpa [#allocation6 + $0x1], 1 }
 0x22f   :  { %742 = vsyncpa [#allocation7], 1 }
 0x230   :  { %744 = vsyncpa [#allocation7 + $0x1], 1 }
 0x231   :  { %745 = vsyncpa [#allocation10], 1 }

</bundles_post_ra>
